<compile_context>
chip_gen: v5e
topology: v5e:2x2
jax: 0.10.0
libtpu: 0.0.40
codegen_flags: <defaults>
</compile_context>

<pallas_src>
import functools

import jax
import jax.numpy as jnp
from jax.experimental import pallas as pl
from jax.experimental.pallas import tpu as pltpu

CPAD = 128  # lane-dense padding for both channels (K) and classes (N)


def _gap_linear_kernel(x_ref, w_ref, b_ref, o_ref, *, inv_hw):
    """Fused avg_pool2d(x, W) + flatten + Linear.

    x_ref: (N, H*W, CPAD) f32  activation, channels on the lane axis
    w_ref: (CPAD, CPAD)   f32  linear weight laid out (in_channel, class), padded
    b_ref: (1, CPAD)      f32  linear bias, padded
    o_ref: (N, CPAD)      f32  lane-dense padded logits
    """
    # Global average pool: sum over the H*W (sublane) axis, scale by 1/HW.
    pooled = jnp.sum(x_ref[...], axis=1) * inv_hw                   # (N, CPAD)
    # Linear layer on the MXU with f32 accumulation.
    o_ref[...] = jnp.dot(pooled, w_ref[...],
                         preferred_element_type=jnp.float32) + b_ref[...]


def make_classifier(weight, bias):
    """Build the jitted forward for ClassifierModule(channel, num_classes).

    weight: (num_classes, channel) f32   -- nn.Linear.weight
    bias:   (num_classes,)         f32   -- nn.Linear.bias
    """
    num_classes, channel = weight.shape
    assert channel <= CPAD and num_classes <= CPAD

    # One-time lane-dense packing (hoisted out of the forward, per perf review).
    w_pad = jnp.zeros((CPAD, CPAD), jnp.float32)
    w_pad = w_pad.at[:channel, :num_classes].set(weight.T.astype(jnp.float32))
    b_pad = jnp.zeros((1, CPAD), jnp.float32)
    b_pad = b_pad.at[0, :num_classes].set(bias.astype(jnp.float32))

    @jax.jit
    def forward(x_nchw):
        n, c, h, w = x_nchw.shape
        assert c == channel, "channel mismatch with Linear weight"
        # TODO(synk): non-square inputs (H != W) in PyTorch pool only the first
        #             W rows (kernel=stride=W); only the square case is handled.
        assert h == w, "only square spatial inputs are supported"

        # NCHW -> (N, H*W, CPAD): channels on the 128-lane axis (lane-dense).
        x = jnp.transpose(x_nchw, (0, 2, 3, 1)).astype(jnp.float32)
        x = jnp.pad(x, ((0, 0), (0, 0), (0, 0), (0, CPAD - c)))
        x = x.reshape(n, h * w, CPAD)

        vmem = pl.BlockSpec(memory_space=pltpu.MemorySpace.VMEM)
        logits = pl.pallas_call(
            functools.partial(_gap_linear_kernel, inv_hw=1.0 / (h * w)),
            out_shape=jax.ShapeDtypeStruct((n, CPAD), jnp.float32),
            in_specs=[vmem, vmem, vmem],
            out_specs=vmem,
        )(x, w_pad, b_pad)

        # Padded lanes hold zeros (weight/bias pads are zero); slice outside.
        return logits[:, :num_classes]

    return forward


if __name__ == "__main__":
    key = jax.random.PRNGKey(0)
    kx, kw, kb = jax.random.split(key, 3)

    # Shapes implied by the module: last-stage ResNet activation into the head.
    batch, channel, spatial, num_classes = 2, 64, 8, 10
    x = jax.random.normal(kx, (batch, channel, spatial, spatial), jnp.float32)

    # nn.Linear default init: U(-1/sqrt(fan_in), 1/sqrt(fan_in))
    bound = 1.0 / float(jnp.sqrt(jnp.float32(channel)))
    weight = jax.random.uniform(kw, (num_classes, channel), jnp.float32,
                                -bound, bound)
    bias = jax.random.uniform(kb, (num_classes,), jnp.float32, -bound, bound)

    forward = make_classifier(weight, bias)
    out = forward(x)
    jax.block_until_ready(out)

    # Pure-JAX reference == PyTorch ClassifierModule.forward (eval, f32).
    ref = jnp.mean(x, axis=(2, 3)) @ weight.T + bias

    assert out.shape == (batch, num_classes) and out.dtype == jnp.float32
    assert bool(jnp.allclose(out, ref, rtol=1e-5, atol=1e-5)), (
        "mismatch, max err = %e" % float(jnp.max(jnp.abs(out - ref))))
    print("KERNEL_OK")
</pallas_src>

<mosaic_0001>
module attributes {stable_mosaic.version = 11 : i64} {
  func.func @_gap_linear_kernel(%arg0: memref<2x64x128xf32, #tpu.memory_space<vmem>>, %arg1: memref<128x128xf32, #tpu.memory_space<vmem>>, %arg2: memref<1x128xf32, #tpu.memory_space<vmem>>, %arg3: memref<2x128xf32, #tpu.memory_space<vmem>>) attributes {dimension_semantics = [], scalar_prefetch = 0 : i64, scratch_operands = 0 : i64, tpu.core_type = #tpu.core_type<tc>} {
    %c0 = arith.constant 0 : index
    %c0_0 = arith.constant 0 : index
    %c0_1 = arith.constant 0 : index
    %0 = vector.load %arg0[%c0, %c0_0, %c0_1] : memref<2x64x128xf32, #tpu.memory_space<vmem>>, vector<2x64x128xf32>
    %cst = arith.constant dense<0.000000e+00> : vector<2x128xf32>
    %1 = vector.multi_reduction <add>, %0, %cst [1] : vector<2x64x128xf32> to vector<2x128xf32>
    %cst_2 = arith.constant 1.562500e-02 : f32
    %2 = vector.broadcast %cst_2 : f32 to vector<2x128xf32>
    %3 = arith.mulf %1, %2 : vector<2x128xf32>
    %c0_3 = arith.constant 0 : index
    %c0_4 = arith.constant 0 : index
    %4 = vector.load %arg1[%c0_3, %c0_4] : memref<128x128xf32, #tpu.memory_space<vmem>>, vector<128x128xf32>
    %cst_5 = arith.constant dense<0.000000e+00> : vector<2x128xf32>
    %5 = tpu.matmul %3, %4, %cst_5 {dimension_numbers = #tpu.dot_dimension_numbers<[1], [0], [0], [1], [0, 0, 1, 1], [], []>} : vector<2x128xf32>, vector<128x128xf32>, vector<2x128xf32> -> vector<2x128xf32>
    %c0_6 = arith.constant 0 : index
    %c0_7 = arith.constant 0 : index
    %6 = vector.load %arg2[%c0_6, %c0_7] : memref<1x128xf32, #tpu.memory_space<vmem>>, vector<1x128xf32>
    %7 = vector.broadcast %6 : vector<1x128xf32> to vector<2x128xf32>
    %8 = arith.addf %5, %7 : vector<2x128xf32>
    %c0_8 = arith.constant 0 : index
    %c0_9 = arith.constant 0 : index
    %9 = vector.load %arg3[%c0_8, %c0_9] : memref<2x128xf32, #tpu.memory_space<vmem>>, vector<2x128xf32>
    tpu.vector_store %arg3[%c0_8, %c0_9], %8 {strides = array<i32>} : memref<2x128xf32, #tpu.memory_space<vmem>>, vector<2x128xf32>,
    return
  }
}

</mosaic_0001>

<bundles_post_ra>
// kernel: forward.1
= control target key start
LH: loop header
LB: loop body
LE: loop exit
PB: predicated region body
PF: predicated region fallthrough
CT: control target
= control target key end

     0   :  { %s272_s0 = inlined_call_operand.vmem [shape: f32[2,64,128], index: 0, kind: input, shape index: {}]   ;;  %s273_s1 = inlined_call_operand.vmem [shape: f32[128,128], index: 1, kind: input, shape index: {}]   ;;  %s274_s2 = inlined_call_operand.vmem [shape: f32[1,128], index: 2, kind: input, shape index: {}]   ;;  %s275_s3 = inlined_call_operand.hbm [shape: f32[2,128], index: 3, kind: output, shape index: {}]  }
   0x1   :  { %v74_v0 = vld [vmem:[%s273_s1 + $0x78] sm:$0xff]  ;;  %v73_v1 = vld [vmem:[%s273_s1 + $0x70] sm:$0xff]  ;;  %v72_v2 = vld [vmem:[%s273_s1 + $0x68] sm:$0xff] }
   0x2   :  { %84 = vmatpush.msra.mxu0 %v74_v0  ;;  %v71_v3 = vld [vmem:[%s273_s1 + $0x60] sm:$0xff]  ;;  %v16_v5 = vld [vmem:[%s272_s0 + $0x8] sm:$0xff]  ;;  %v70_v6 = vld [vmem:[%s273_s1 + $0x58] sm:$0xff] }
   0x3   :  { %v15_v4 = vld [vmem:[%s272_s0] sm:$0xff]  ;;  %v17_v7 = vld [vmem:[%s272_s0 + $0x10] sm:$0xff]  ;;  %v18_v10 = vld [vmem:[%s272_s0 + $0x18] sm:$0xff] }
   0x4   :  { %85 = vmatpush.msra.mxu0 %v73_v1  ;;  %v31_v8 = vadd.f32 %v16_v5, %v15_v4  ;;  %v69_v9 = vld [vmem:[%s273_s1 + $0x50] sm:$0xff]  ;;  %v23_v11 = vld [vmem:[%s272_s0 + $0x40] sm:$0xff]  ;;  %v24_v12 = vld [vmem:[%s272_s0 + $0x48] sm:$0xff] }
   0x5   :  { %v25_v13 = vld [vmem:[%s272_s0 + $0x50] sm:$0xff]  ;;  %v19_v15 = vld [vmem:[%s272_s0 + $0x20] sm:$0xff]  ;;  %v44_v16 = vadd.f32 %v24_v12, %v23_v11  ;;  %v68_v17 = vld [vmem:[%s273_s1 + $0x48] sm:$0xff] }
   0x6   :  { %86 = vmatpush.msra.mxu0 %v72_v2  ;;  %v32_v14 = vadd.f32 %v31_v8, %v17_v7  ;;  %v26_v18 = vld [vmem:[%s272_s0 + $0x58] sm:$0xff]  ;;  %v20_v20 = vld [vmem:[%s272_s0 + $0x28] sm:$0xff] }
   0x7   :  { %v45_v21 = vadd.f32 %v44_v16, %v25_v13 }
   0x8   :  { %87 = vmatpush.msra.mxu0 %v71_v3  ;;  %v33_v19 = vadd.f32 %v32_v14, %v18_v10 }
   0xa   :  { %88 = vmatpush.msra.mxu0 %v70_v6 }
   0xc   :  { %89 = vmatpush.msra.mxu0 %v69_v9 }
   0xd   :  { %8 = vsyncpa [#allocation3], 0  ;;  %v67_v22 = vld [vmem:[%s273_s1 + $0x40] sm:$0xff]  ;;  %v34_v24 = vadd.f32 %v33_v19, %v19_v15  ;;  %v21_v25 = vld [vmem:[%s272_s0 + $0x30] sm:$0xff]  ;;  %v46_v26 = vadd.f32 %v45_v21, %v26_v18  ;;  %vm81_vm0 = vcmask 1041409   ;;  %s149_s23 = smov [#allocation2]  }
   0xe   :  { %v27_v23 = vld [vmem:[%s272_s0 + $0x60] sm:$0xff]  ;;  %90 = vmatpush.msra.mxu0 %v68_v17  ;;  %v66_v27 = vld [vmem:[%s273_s1 + $0x38] sm:$0xff]  ;;  %v28_v28 = vld [vmem:[%s272_s0 + $0x68] sm:$0xff]  ;;  %s110_s24 = sshll.u32 %s149_s23, 4  ;;  %s112_s26 = sshll.u32 %s275_s3, 4  ;;  %s111_s24 = int_to_ptr.vmem [resolvable:$true] %s110_s24  ;;  %s113_s26 = int_to_ptr.hbm [resolvable:$true] %s112_s26 }
   0xf   :  { %v35_v29 = vadd.f32 %v34_v24, %v20_v20  ;;  %v22_v30 = vld [vmem:[%s272_s0 + $0x38] sm:$0xff]  ;;  %v47_v31 = vadd.f32 %v46_v26, %v27_v23  ;;  %v65_v32 = vld [vmem:[%s273_s1 + $0x30] sm:$0xff]  ;;  %v64_v36 = vld [vmem:[%s273_s1 + $0x28] sm:$0xff] }
  0x10   :  { %91 = vmatpush.msra.mxu0 %v67_v22  ;;  %v29_v33 = vld [vmem:[%s272_s0 + $0x70] sm:$0xff]  ;;  %v30_v37 = vld [vmem:[%s272_s0 + $0x78] sm:$0xff]  ;;  %v63_v40 = vld [vmem:[%s273_s1 + $0x20] sm:$0xff] }
  0x11   :  { %v36_v34 = vadd.f32 %v35_v29, %v21_v25  ;;  %v48_v35 = vadd.f32 %v47_v31, %v28_v28  ;;  %v62_v43 = vld [vmem:[%s273_s1 + $0x18] sm:$0xff]  ;;  %v61_v46 = vld [vmem:[%s273_s1 + $0x10] sm:$0xff]  ;;  %v60_v49 = vld [vmem:[%s273_s1 + $0x8] sm:$0xff] }
  0x12   :  { %92 = vmatpush.msra.mxu0 %v66_v27  ;;  %v59_v52 = vld [vmem:[%s273_s1] sm:$0xff] }
  0x13   :  { %v37_v38 = vadd.f32 %v36_v34, %v22_v30  ;;  %v49_v39 = vadd.f32 %v48_v35, %v29_v33  ;;  %v122_v61 = vld [vmem:[%s274_s2] ss:$0 sm:$0xff] }
  0x14   :  { %93 = vmatpush.msra.mxu0 %v65_v32 }
  0x15   :  { %v38_v41 = vrot.slane %v37_v38, 4  ;;  %v50_v42 = vadd.f32 %v49_v39, %v30_v37 }
  0x16   :  { %94 = vmatpush.msra.mxu0 %v64_v36 }
  0x17   :  { %v39_v44 = vadd.f32 %v38_v41, %v37_v38  ;;  %v51_v45 = vrot.slane %v50_v42, 4 }
  0x18   :  { %95 = vmatpush.msra.mxu0 %v63_v40 }
  0x19   :  { %v40_v47 = vrot.slane %v39_v44, 2  ;;  %v52_v48 = vadd.f32 %v51_v45, %v50_v42 }
  0x1a   :  { %96 = vmatpush.msra.mxu0 %v62_v43 }
  0x1b   :  { %v41_v50 = vadd.f32 %v40_v47, %v39_v44  ;;  %v53_v51 = vrot.slane %v52_v48, 2 }
  0x1c   :  { %97 = vmatpush.msra.mxu0 %v61_v46 }
  0x1d   :  { %v42_v53 = vrot.slane %v41_v50, 1  ;;  %v54_v54 = vadd.f32 %v53_v51, %v52_v48 }
  0x1e   :  { %98 = vmatpush.msra.mxu0 %v60_v49 }
  0x1f   :  { %v43_v55 = vadd.f32 %v42_v53, %v41_v50  ;;  %v55_v56 = vrot.slane %v54_v54, 1 }
  0x20   :  { %99 = vmatpush.msra.mxu0 %v59_v52 }
  0x21   :  { %v56_v57 = vadd.f32 %v55_v56, %v54_v54  ;;  %v57_v58 = vmul.f32 0.015625, %v43_v55 }
  0x23   :  { %v58_v59 = vmul.f32 0.015625, %v56_v57 }
  0x25   :  { %v82_v60 = vsel %vm81_vm0, %v58_v59, %v57_v58 }
  0x26   :  { %100 = vmatmul.f32.vlgmr.msra.gmra.mxu0 %v82_v60 }
  0xa3   :  { %v101_v62 = vpop.f32.mrf.mxu0 }
  0xa4   :  { %v102_v63 = vadd.f32 %v122_v61, %v101_v62 }
  0xa6   :  { %104 = vst [vmem:[#allocation2] sm:$0x3] %v102_v63 }
  0xa7   :  { %115 = dma.vmem_to_hbm [thread:$0]  %s111_s24, 32, %s113_s26, [#allocation3]  }
  0xa8   :  { %147 = dma.done.wait [#allocation3], 32  }
  0xa9   :  { %148 = vsyncadd [#allocation3], 4294967264 }
  0xaa   :  { %120 = vsyncpa [#allocation3], 1 }

</bundles_post_ra>
